<compile_context>
chip_gen: v6e
topology: v6e:2x2x1
jax: 0.10.0
libtpu: 0.0.40
codegen_flags: <defaults>
</compile_context>

<pallas_src>
import jax
import jax.numpy as jnp
from jax import lax
from jax.experimental import pallas as pl
from jax.experimental.pallas import tpu as pltpu

LANES = 128
TARGET_BLOCK_ROWS = 1024   # ~512 KiB per f32 input tile
NUM_SHARDS = 2             # "parallel" axis: uses both TCs on v7x, serial elsewhere


def _round_up(x: int, m: int) -> int:
    return ((x + m - 1) // m) * m


def _sublane_multiple(dtype) -> int:
    # min sublane packing of the second-to-last dim: 8 (4B), 16 (2B), 32 (1B)
    itemsize = jnp.dtype(dtype).itemsize
    return max(8, 32 // max(itemsize, 1))


def l2_error(inp: jax.Array, target: jax.Array) -> jax.Array:
    """sqrt(sum((inp - target)^2)) / sqrt(sum(target^2)) via a Pallas reduction."""
    x = jnp.reshape(inp, (-1,))
    t = jnp.reshape(target, (-1,))
    n = x.shape[0]

    # Lane-major 2-D layout (rows, 128). Only pad the tiny ragged tail below one
    # lane row (< 128 elems); zero padding contributes 0 to both squared sums.
    n_lane = _round_up(n, LANES)
    if n_lane != n:
        x = jnp.pad(x, (0, n_lane - n))
        t = jnp.pad(t, (0, n_lane - n))
    rows = n_lane // LANES
    x2 = x.reshape(rows, LANES)
    t2 = t.reshape(rows, LANES)

    sub = max(_sublane_multiple(x2.dtype), _sublane_multiple(t2.dtype))
    block_rows = min(_round_up(TARGET_BLOCK_ROWS, sub), _round_up(rows, sub))
    num_blocks = pl.cdiv(rows, block_rows)
    bps = pl.cdiv(num_blocks, NUM_SHARDS)   # row-blocks per shard

    def in_index_map(s, i):
        # Clamp so padded shard steps re-read the last valid block; their
        # contribution is masked to zero inside the kernel.
        return (jnp.minimum(s * bps + i, num_blocks - 1), 0)

    def kernel(x_ref, t_ref, num_ref, den_ref):
        # Zero the resident per-shard accumulators at the start of each shard.
        @pl.when(pl.program_id(1) == 0)
        def _():
            num_ref[...] = jnp.zeros_like(num_ref)
            den_ref[...] = jnp.zeros_like(den_ref)

        xv = x_ref[...].astype(jnp.float32)
        tv = t_ref[...].astype(jnp.float32)

        # Mask rows beyond the true extent (ragged last block / clamped padded
        # shard steps). Static `rows` closed over; one compare+select per tile,
        # hidden under the DMA bottleneck.
        logical_block = pl.program_id(0) * bps + pl.program_id(1)
        row0 = logical_block * block_rows
        row_ids = row0 + lax.broadcasted_iota(jnp.int32, (block_rows, LANES), 0)
        valid = row_ids < rows

        d = xv - tv
        d2 = jnp.where(valid, d * d, 0.0)
        tt = jnp.where(valid, tv * tv, 0.0)

        # Fold (block_rows, 128) -> (8, 128): pure vreg-wise VPU adds (no XLU).
        num_ref[...] += jnp.sum(d2.reshape(block_rows // 8, 8, LANES), axis=0)
        den_ref[...] += jnp.sum(tt.reshape(block_rows // 8, 8, LANES), axis=0)

    tile_in_bytes = block_rows * LANES * (x2.dtype.itemsize + t2.dtype.itemsize)
    vmem_limit = int(min(max(4 * tile_in_bytes + (2 << 20), 16 << 20), 32 << 20))

    out_part_shape = jax.ShapeDtypeStruct((NUM_SHARDS, 8, LANES), jnp.float32)
    out_spec = pl.BlockSpec((None, 8, LANES), lambda s, i: (s, 0, 0))

    cost = pl.CostEstimate(
        flops=6 * n,
        transcendentals=0,
        bytes_accessed=int(
            x2.size * x2.dtype.itemsize
            + t2.size * t2.dtype.itemsize
            + 2 * NUM_SHARDS * 8 * LANES * 4
        ),
    )

    num_p, den_p = pl.pallas_call(
        kernel,
        out_shape=(out_part_shape, out_part_shape),
        grid_spec=pltpu.PrefetchScalarGridSpec(
            num_scalar_prefetch=0,
            grid=(NUM_SHARDS, bps),
            in_specs=[
                pl.BlockSpec((block_rows, LANES), in_index_map),
                pl.BlockSpec((block_rows, LANES), in_index_map),
            ],
            out_specs=(out_spec, out_spec),
        ),
        compiler_params=pltpu.CompilerParams(
            dimension_semantics=("parallel", "arbitrary"),
            vmem_limit_bytes=vmem_limit,
        ),
        cost_estimate=cost,
    )(x2, t2)

    # Tiny final reduce + sqrt ratio in JAX glue.
    num_sum = jnp.sum(num_p)
    den_sum = jnp.sum(den_p)
    return jnp.sqrt(num_sum) / jnp.sqrt(den_sum)


if __name__ == "__main__":
    key = jax.random.PRNGKey(0)
    k1, k2 = jax.random.split(key)
    shape = (2, 4, 16, 16)  # batch=2, channels=4, spatial=16x16
    inp = jax.random.normal(k1, shape, dtype=jnp.float32)
    target = jax.random.normal(k2, shape, dtype=jnp.float32)

    out = l2_error(inp, target)
    jax.block_until_ready(out)

    # Pure-JAX reference with the same semantics as the PyTorch module.
    xi = inp.reshape(-1)
    ti = target.reshape(-1)
    ref = jnp.sqrt(jnp.sum((xi - ti) ** 2)) / jnp.sqrt(jnp.sum(ti ** 2))
    assert jnp.allclose(out, ref, rtol=1e-5, atol=1e-6), (out, ref)

    print("KERNEL_OK")
</pallas_src>

<mosaic_0001>
module attributes {stable_mosaic.version = 11 : i64} {
  func.func @kernel(%arg0: i32, %arg1: i32, %arg2: memref<16x128xf32, #tpu.memory_space<vmem>>, %arg3: memref<16x128xf32, #tpu.memory_space<vmem>>, %arg4: memref<1x8x128xf32, #tpu.memory_space<vmem>>, %arg5: memref<1x8x128xf32, #tpu.memory_space<vmem>>) attributes {dimension_semantics = [#tpu.dimension_semantics<parallel>, #tpu.dimension_semantics<arbitrary>], iteration_bounds = array<i64: 2, 1>, scalar_prefetch = 0 : i64, scratch_operands = 0 : i64, tpu.core_type = #tpu.core_type<tc>, window_params = [{transform_indices = @transform_0, window_bounds = array<i64: 16, 128>}, {transform_indices = @transform_1, window_bounds = array<i64: 16, 128>}, {transform_indices = @transform_2, window_bounds = array<i64: 1, 8, 128>}, {transform_indices = @transform_3, window_bounds = array<i64: 1, 8, 128>}]} {
    %c0_i32 = arith.constant 0 : i32
    %0 = arith.cmpi eq, %arg1, %c0_i32 : i32
    %1 = arith.extui %0 : i1 to i32
    %c0_i32_0 = arith.constant 0 : i32
    %2 = arith.cmpi ne, %1, %c0_i32_0 : i32
    scf.if %2 {
      %cst_20 = arith.constant 0.000000e+00 : f32
      %36 = vector.broadcast %cst_20 : f32 to vector<8x128xf32>
      %c0_21 = arith.constant 0 : index
      %c0_22 = arith.constant 0 : index
      %c0_23 = arith.constant 0 : index
      %37 = vector.load %arg4[%c0_21, %c0_22, %c0_23] : memref<1x8x128xf32, #tpu.memory_space<vmem>>, vector<1x8x128xf32>
      %38 = vector.shape_cast %37 : vector<1x8x128xf32> to vector<8x128xf32>
      %39 = vector.shape_cast %36 : vector<8x128xf32> to vector<1x8x128xf32>
      tpu.vector_store %arg4[%c0_21, %c0_22, %c0_23], %39 {strides = array<i32>} : memref<1x8x128xf32, #tpu.memory_space<vmem>>, vector<1x8x128xf32>,
      %cst_24 = arith.constant 0.000000e+00 : f32
      %40 = vector.broadcast %cst_24 : f32 to vector<8x128xf32>
      %c0_25 = arith.constant 0 : index
      %c0_26 = arith.constant 0 : index
      %c0_27 = arith.constant 0 : index
      %41 = vector.load %arg5[%c0_25, %c0_26, %c0_27] : memref<1x8x128xf32, #tpu.memory_space<vmem>>, vector<1x8x128xf32>
      %42 = vector.shape_cast %41 : vector<1x8x128xf32> to vector<8x128xf32>
      %43 = vector.shape_cast %40 : vector<8x128xf32> to vector<1x8x128xf32>
      tpu.vector_store %arg5[%c0_25, %c0_26, %c0_27], %43 {strides = array<i32>} : memref<1x8x128xf32, #tpu.memory_space<vmem>>, vector<1x8x128xf32>,
    } else {
    }
    %c0 = arith.constant 0 : index
    %c0_1 = arith.constant 0 : index
    %3 = vector.load %arg2[%c0, %c0_1] : memref<16x128xf32, #tpu.memory_space<vmem>>, vector<16x128xf32>
    %c0_2 = arith.constant 0 : index
    %c0_3 = arith.constant 0 : index
    %4 = vector.load %arg3[%c0_2, %c0_3] : memref<16x128xf32, #tpu.memory_space<vmem>>, vector<16x128xf32>
    %c1_i32 = arith.constant 1 : i32
    %5 = arith.muli %arg0, %c1_i32 : i32
    %6 = arith.addi %5, %arg1 : i32
    %c16_i32 = arith.constant 16 : i32
    %7 = arith.muli %6, %c16_i32 : i32
    %8 = tpu.iota {dimensions = array<i32: 0>} : vector<16x128xi32>
    %9 = vector.broadcast %7 : i32 to vector<16x128xi32>
    %10 = arith.addi %9, %8 : vector<16x128xi32>
    %c16_i32_4 = arith.constant 16 : i32
    %11 = vector.broadcast %c16_i32_4 : i32 to vector<16x128xi32>
    %12 = arith.cmpi slt, %10, %11 : vector<16x128xi32>
    %13 = arith.subf %3, %4 : vector<16x128xf32>
    %14 = arith.mulf %13, %13 : vector<16x128xf32>
    %cst = arith.constant 0.000000e+00 : f32
    %15 = vector.broadcast %cst : f32 to vector<16x128xf32>
    %16 = arith.select %12, %14, %15 : vector<16x128xi1>, vector<16x128xf32>
    %17 = arith.mulf %4, %4 : vector<16x128xf32>
    %cst_5 = arith.constant 0.000000e+00 : f32
    %18 = vector.broadcast %cst_5 : f32 to vector<16x128xf32>
    %19 = arith.select %12, %17, %18 : vector<16x128xi1>, vector<16x128xf32>
    %c0_6 = arith.constant 0 : index
    %c0_7 = arith.constant 0 : index
    %c0_8 = arith.constant 0 : index
    %20 = vector.load %arg4[%c0_6, %c0_7, %c0_8] : memref<1x8x128xf32, #tpu.memory_space<vmem>>, vector<1x8x128xf32>
    %21 = vector.shape_cast %20 : vector<1x8x128xf32> to vector<8x128xf32>
    %22 = vector.shape_cast %16 : vector<16x128xf32> to vector<2x8x128xf32>
    %cst_9 = arith.constant dense<0.000000e+00> : vector<8x128xf32>
    %23 = vector.multi_reduction <add>, %22, %cst_9 [0] : vector<2x8x128xf32> to vector<8x128xf32>
    %24 = arith.addf %21, %23 : vector<8x128xf32>
    %c0_10 = arith.constant 0 : index
    %c0_11 = arith.constant 0 : index
    %c0_12 = arith.constant 0 : index
    %25 = vector.load %arg4[%c0_10, %c0_11, %c0_12] : memref<1x8x128xf32, #tpu.memory_space<vmem>>, vector<1x8x128xf32>
    %26 = vector.shape_cast %25 : vector<1x8x128xf32> to vector<8x128xf32>
    %27 = vector.shape_cast %24 : vector<8x128xf32> to vector<1x8x128xf32>
    tpu.vector_store %arg4[%c0_10, %c0_11, %c0_12], %27 {strides = array<i32>} : memref<1x8x128xf32, #tpu.memory_space<vmem>>, vector<1x8x128xf32>,
    %c0_13 = arith.constant 0 : index
    %c0_14 = arith.constant 0 : index
    %c0_15 = arith.constant 0 : index
    %28 = vector.load %arg5[%c0_13, %c0_14, %c0_15] : memref<1x8x128xf32, #tpu.memory_space<vmem>>, vector<1x8x128xf32>
    %29 = vector.shape_cast %28 : vector<1x8x128xf32> to vector<8x128xf32>
    %30 = vector.shape_cast %19 : vector<16x128xf32> to vector<2x8x128xf32>
    %cst_16 = arith.constant dense<0.000000e+00> : vector<8x128xf32>
    %31 = vector.multi_reduction <add>, %30, %cst_16 [0] : vector<2x8x128xf32> to vector<8x128xf32>
    %32 = arith.addf %29, %31 : vector<8x128xf32>
    %c0_17 = arith.constant 0 : index
    %c0_18 = arith.constant 0 : index
    %c0_19 = arith.constant 0 : index
    %33 = vector.load %arg5[%c0_17, %c0_18, %c0_19] : memref<1x8x128xf32, #tpu.memory_space<vmem>>, vector<1x8x128xf32>
    %34 = vector.shape_cast %33 : vector<1x8x128xf32> to vector<8x128xf32>
    %35 = vector.shape_cast %32 : vector<8x128xf32> to vector<1x8x128xf32>
    tpu.vector_store %arg5[%c0_17, %c0_18, %c0_19], %35 {strides = array<i32>} : memref<1x8x128xf32, #tpu.memory_space<vmem>>, vector<1x8x128xf32>,
    return
  }
  func.func @transform_0(%arg0: i32, %arg1: i32) -> (i32, i32) {
    %c1_i32 = arith.constant 1 : i32
    %0 = arith.muli %arg0, %c1_i32 : i32
    %1 = arith.addi %0, %arg1 : i32
    %c0_i32 = arith.constant 0 : i32
    %2 = arith.minsi %1, %c0_i32 : i32
    %c0_i32_0 = arith.constant 0 : i32
    %c0_i32_1 = arith.constant 0 : i32
    return %2, %c0_i32_0 : i32, i32
  }
  func.func @transform_1(%arg0: i32, %arg1: i32) -> (i32, i32) {
    %c1_i32 = arith.constant 1 : i32
    %0 = arith.muli %arg0, %c1_i32 : i32
    %1 = arith.addi %0, %arg1 : i32
    %c0_i32 = arith.constant 0 : i32
    %2 = arith.minsi %1, %c0_i32 : i32
    %c0_i32_0 = arith.constant 0 : i32
    %c0_i32_1 = arith.constant 0 : i32
    return %2, %c0_i32_0 : i32, i32
  }
  func.func @transform_2(%arg0: i32, %arg1: i32) -> (i32, i32, i32) {
    %c0_i32 = arith.constant 0 : i32
    %c0_i32_0 = arith.constant 0 : i32
    %c0_i32_1 = arith.constant 0 : i32
    return %arg0, %c0_i32, %c0_i32_0 : i32, i32, i32
  }
  func.func @transform_3(%arg0: i32, %arg1: i32) -> (i32, i32, i32) {
    %c0_i32 = arith.constant 0 : i32
    %c0_i32_0 = arith.constant 0 : i32
    %c0_i32_1 = arith.constant 0 : i32
    return %arg0, %c0_i32, %c0_i32_0 : i32, i32, i32
  }
}

</mosaic_0001>

<bundles_post_ra>
// kernel: tpu_custom_call.1
= control target key start
LH: loop header
LB: loop body
LE: loop exit
PB: predicated region body
PF: predicated region fallthrough
CT: control target
= control target key end

     0   :  { %9 = vsyncpa [#allocation3], 0  ;;  %s1050_s0 = inlined_call_operand.hbm [shape: f32[16,128], index: 0, kind: input, shape index: {}]   ;;  %s1051_s1 = inlined_call_operand.hbm [shape: f32[16,128], index: 1, kind: input, shape index: {}]   ;;  %s1052_s2 = inlined_call_operand.hbm [shape: f32[2,8,128], index: 2, kind: output, shape index: {0}]   ;;  %s1053_s3 = inlined_call_operand.hbm [shape: f32[2,8,128], index: 3, kind: output, shape index: {1}]  }
   0x1   :  { %11 = vsyncpa [#allocation3 + $0x1], 0 }
   0x2   :  { %12 = vsyncpa [#allocation6], 0 }
   0x3   :  { %14 = vsyncpa [#allocation6 + $0x1], 0 }
   0x4   :  { %15 = vsyncpa [#allocation4], 0 }
   0x5   :  { %17 = vsyncpa [#allocation4 + $0x1], 0 }
   0x6   :  { %18 = vsyncpa [#allocation9], 0 }
   0x7   :  { %20 = vsyncpa [#allocation9 + $0x1], 0  ;;  %s823_s12 = smov 0   ;;  %s825_s13 = smov 0  }
   0x8   :  { %s827_s14 = smov 0   ;;  %s829_s15 = smov 0  }
   0x9   :  { %s831_s16 = smov 0   ;;  %s833_s17 = smov 0  }
   0xa   :  { %s835_s18 = smov 0   ;;  %s837_s19 = smov 0  }
   0xb LB: > { %s481_s20 = sadd.s32 4294967295, %s795_s19   ;;  %s482_s21 = sadd.s32 4294967294, %s795_s19   ;;  %s795_s19 = sphi %s837_s19, %s26_s19   ;;  %s791_s18 = sphi %s835_s18, %s1072_s18   ;;  %s787_s17 = sphi %s833_s17, %s1071_s17   ;;  %s783_s16 = sphi %s831_s16, %s1040_s16   ;;  %s779_s15 = sphi %s829_s15, %s1070_s15   ;;  %s775_s14 = sphi %s827_s14, %s1069_s14   ;;  %s771_s13 = sphi %s825_s13, %s1068_s13   ;;  %s767_s12 = sphi %s823_s12, %s1067_s12  }
   0xc   : > { %s38_s22 = sadd.s32 1, %s791_s18  ;;  %p764_p1 = scmp.ne.s32.totalorder %s783_s16, 0 }
   0xd   : > { %p40_p0 = scmp.ge.s32.totalorder %s38_s22, 2  ;;  %p59_p2 = scmp.eq.s32.totalorder %s795_s19, 0 }
   0xe   : > { %p64_p3 = scmp.ne.s32.totalorder %s783_s16, %s779_s15  ;;  %p65_p5 = scmp.eq.s32.totalorder %s481_s20, 0 }
   0xf   : > { %s1074_s22 = smov (%p40_p0, %s38_s22), 0  ;;  %p869_p4 = por %p764_p1, %p59_p2 }
  0x10   : > { %p873_p6 = por %p65_p5, %p64_p3  ;;  %s106_s25 = ssub.s32 %s791_s18, %s1074_s22 }
  0x11   : > { %p107_p7 = scmp.eq.s32.totalorder %s106_s25, 0  ;;  %s109_s26 = sadd.s32 1, %s775_s14 }
  0x12   : > { %s1057_s24 = scalar_select %p873_p6, 1, 0 }
  0x13   : > { %s881_s27 = scalar_select %p107_p7, %s775_s14, %s109_s26  }
  0x14   : > { %p119_p8 = scmp.ne.s32.totalorder %s775_s14, %s771_s13  ;;  %p120_p9 = scmp.eq.s32.totalorder %s481_s20, 1 }
  0x15   : > { %p125_p10 = scmp.ne.s32.totalorder %s771_s13, %s767_s12  ;;  %p126_p11 = scmp.eq.s32.totalorder %s482_s21, 1 }
  0x16   : > { %p887_p12 = por %p120_p9, %p119_p8  ;;  %p527_p1 = scmp.lt.s32.totalorder %s795_s19, 2 }
  0x17   : > { %p892_p0 = por %p126_p11, %p125_p10  ;;  %s797_s30 = smov [#allocation2]  }
  0x18   : > { %s1058_s28 = scalar_select %p887_p12, 1, 0 }
  0x19   : > { %s1059_s29 = scalar_select %p892_p0, 1, 0 }
  0x1a   : > { %s186_s4 = sshll.u32 %s797_s30, 4  ;;  %p899_p2 = pnand %p527_p1, %p869_p4  ;;  %s187_s4 = int_to_ptr.vmem [resolvable:$true] %s186_s4 }
  0x1b   : > { %s604_s8 = scalar_lea.hbm %s1050_s0, 256 }
  0x1c   : > { %p605_p3 = scmp.ne.s32.totalorder %s1050_s0, %s604_s8  ;;  %p606_p5 = pneg %p899_p2 }
  0x1d   : > { %p611_p8 = scmp.lt.s32.totalorder %s604_s8, %s604_s8 }
  0x1e   : > { %p607_p7 = pnand %p606_p5, %p605_p3 }
  0x20   : > { %p608_p4 = pneg %p607_p7 }
  0x22   : > { %p613_p9 = pnand %p611_p8, %p608_p4 }
  0x24   : > { %616 = shalt.err (!%p613_p9)
}
  0x25   : > { %s617_s11 = scalar_lea.vmem %s187_s4, 256  ;;  %s624_s15 = scalar_lea.vmem %s187_s4, 512 }
  0x26   : > { %p618_p10 = scmp.ne.s32.totalorder %s187_s4, %s617_s11  ;;  %p625_p13 = scmp.lt.s32.totalorder %s187_s4, %s187_s4 }
  0x27   : > { %p626_p0 = scmp.lt.s32.totalorder %s624_s15, %s617_s11 }
  0x28   : > { %p620_p11 = pnand %p618_p10, %p606_p5 }
  0x29   : > { %p627_p12 = por %p626_p0, %p625_p13 }
  0x2a   : > { %p621_p1 = pneg %p620_p11 }
  0x2c   : > { %p628_p6 = pnand %p627_p12, %p621_p1 }
  0x2e   : > { %631 = shalt.err (!%p628_p6)
}
  0x2f   : > { %s798_s20 = smov 128   ;;  %s799_s21 = smov 8  }
  0x30   : > { %516 = dma.hbm_to_vmem [thread:$0]  (!%p899_p2), %s1050_s0, 256, %s187_s4, [#allocation3], %s798_s20, %s798_s20, %s799_s21  }
  0x31   : > { %p491_p3 = scmp.ge.s32.totalorder %s795_s19, 1  ;;  %p218_p7 = scmp.lt.s32.totalorder %s795_s19, 3 }
  0x32   : > { %s800_s30 = smov [#allocation5]   ;;  %s632_s9 = scalar_lea.hbm %s1051_s1, 256 }
  0x33   : > { %p924_p4 = pnand %p491_p3, %p218_p7  ;;  %s210_s6 = sshll.u32 %s800_s30, 4  ;;  %s211_s6 = int_to_ptr.vmem [resolvable:$true] %s210_s6 }
  0x34   : > { %p633_p6 = scmp.ne.s32.totalorder %s1051_s1, %s632_s9  ;;  %p639_p0 = scmp.lt.s32.totalorder %s632_s9, %s632_s9 }
  0x35   : > { %s1061_s26 = scalar_select %p924_p4, 1, 0 }
  0x36   : > { %p635_p12 = pnand %p633_p6, %p606_p5 }
  0x38   : > { %p636_p13 = pneg %p635_p12 }
  0x3a   : > { %p641_p8 = pnand %p639_p0, %p636_p13 }
  0x3c   : > { %644 = shalt.err (!%p641_p8)
}
  0x3d   : > { %s645_s4 = scalar_lea.vmem %s211_s6, 256  ;;  %s652_s15 = scalar_lea.vmem %s211_s6, 512 }
  0x3e   : > { %p646_p9 = scmp.ne.s32.totalorder %s211_s6, %s645_s4  ;;  %p653_p1 = scmp.lt.s32.totalorder %s211_s6, %s211_s6 }
  0x3f   : > { %p654_p3 = scmp.lt.s32.totalorder %s652_s15, %s645_s4 }
  0x40   : > { %p648_p10 = pnand %p646_p9, %p606_p5 }
  0x41   : > { %p655_p7 = por %p654_p3, %p653_p1 }
  0x42   : > { %p649_p11 = pneg %p648_p10 }
  0x44   : > { %p656_p4 = pnand %p655_p7, %p649_p11 }
  0x46   : > { %659 = shalt.err (!%p656_p4)
}
  0x47   : > { %519 = dma.hbm_to_vmem [thread:$0]  (!%p899_p2), %s1051_s1, 256, %s211_s6, [#allocation6], %s798_s20, %s798_s20, %s799_s21  }
  0x48   : > { %p1062_p6 = scmp.ne.s32.totalorder %s1061_s26, 0 }
  0x49   : > { %s224_s30 = sand.u32 (!%p1062_p6), 1, %s783_s16   ;;  %p1063_p5 = scmp.ne.s32.totalorder (!%p1062_p6), %s1057_s24, 0 }
  0x4a   : > { %222 = sbr.rel (%p1062_p6) target bundleno = 132 (0x84), region = 28  ;;  %s492_s7 = sshll.u32 (!%p1062_p6), %s224_s30, 4 }
  0x4b   : > { %s225_s8 = scalar_lea.sflag (!%p1062_p6), [#allocation3], %s224_s30  ;;  %s228_s9 = scalar_lea.vmem (!%p1062_p6), [#allocation2], %s492_s7 }
  0x4f   : > { %749 = dma.done.wait (%p1063_p5), %s225_s8, 256  }
  0x50   : > { %751 = vsyncadd (%p1063_p5), %s225_s8, 4294967040  ;;  %s234_s5 = scalar_lea.sflag [#allocation6], %s224_s30  ;;  %s237_s10 = scalar_lea.vmem [#allocation5], %s492_s7 }
  0x51   : > { %753 = dma.done.wait (%p1063_p5), %s234_s5, 256  }
  0x52   : > { %755 = vsyncadd (%p1063_p5), %s234_s5, 4294967040  ;;  %s496_s20 = sshll.u32 %s787_s17, 4  ;;  %v290_v0 = vlaneseq  ;;  %s958_s21 = sand.u32 1, %s771_s13   ;;  %v284_v6 = vld [vmem:[%s228_s9] sm:$0xff]  ;;  %v285_v7 = vld [vmem:[%s228_s9 + $0x8] sm:$0xff] }
  0x53   : > { %v293_v1 = vstv %s496_s20  ;;  %s494_s26 = sshll.u32 %s958_s21, 3  ;;  %v286_v8 = vld [vmem:[%s237_s10] sm:$0xff]  ;;  %v287_v9 = vld [vmem:[%s237_s10 + $0x8] sm:$0xff]  ;;  %s499_s24 = sshll.u32 %s787_s17, 7 }
  0x54   : > { %v291_v2 = vshrl.u32 %v290_v0, 7  ;;  %v298_v10 = vsub.f32 %v284_v6, %v286_v8  ;;  %v304_v11 = vmul.f32 %v286_v8, %v286_v8  ;;  %v299_v12 = vsub.f32 %v285_v7, %v287_v9  ;;  %s269_s6 = scalar_lea.vmem [#allocation8], %s494_s26  ;;  %s962_s4 = scalar_lea.vmem [#allocation7], %s494_s26 }
  0x55   : > { %v305_v13 = vmul.f32 %v287_v9, %v287_v9  ;;  %s348_s11 = sshll.u32 %s269_s6, 4  ;;  %s335_s15 = sshll.u32 %s962_s4, 4  ;;  %s970_s11 = int_to_ptr.vmem [resolvable:$true] %s348_s11  ;;  %s977_s15 = int_to_ptr.vmem [resolvable:$true] %s335_s15 }
  0x56   : > { %v292_v3 = vadd.s32 8, %v291_v2  ;;  %v294_v4 = vadd.s32 %v293_v1, %v291_v2  ;;  %v300_v14 = vmul.f32 %v298_v10, %v298_v10  ;;  %v301_v16 = vmul.f32 %v299_v12, %v299_v12  ;;  %s968_s30 = scalar_lea.hbm %s1053_s3, %s499_s24  ;;  %s975_s8 = scalar_lea.hbm %s1052_s2, %s499_s24 }
  0x57   : > { %s322_s9 = scalar_lea.sflag [#allocation9], %s958_s21  ;;  %s660_s5 = scalar_lea.vmem %s970_s11, 128 }
  0x58   : > { %v295_v5 = vadd.s32 %v293_v1, %v292_v3  ;;  %vm296_vm0 = vcmp.lt.s32.totalorder %v294_v4, 16  ;;  %p661_p2 = scmp.ne.s32.totalorder %s970_s11, %s660_s5  ;;  %p1064_p4 = scmp.ne.s32.totalorder %s1058_s28, 0 }
  0x59   : > { %v306_v15 = vsel %vm296_vm0, %v304_v11, 0.0  ;;  %v302_v18 = vsel %vm296_vm0, %v300_v14, 0.0  ;;  %s801_s10 = smov [#allocation8]  }
  0x5a   : > { %vm297_vm1 = vcmp.lt.s32.totalorder %v295_v5, 16  ;;  %p662_p12 = pnand %p661_p2, %p1064_p4  ;;  %s664_s20 = sshll.u32 %s801_s10, 4  ;;  %s665_s20 = int_to_ptr.vmem [resolvable:$false] %s664_s20 }
  0x5b   : > { %v307_v17 = vsel %vm297_vm1, %v305_v13, 0.0  ;;  %v303_v20 = vsel %vm297_vm1, %v301_v16, 0.0  ;;  %s666_s26 = scalar_lea.vmem %s665_s20, 256  ;;  %p667_p0 = scmp.lt.s32.totalorder %s970_s11, %s665_s20 }
  0x5c   : > { %v313_v19 = vadd.f32 %v307_v17, %v306_v15  ;;  %v309_v21 = vadd.f32 %v303_v20, %v302_v18  ;;  %p663_p13 = pneg %p662_p12  ;;  %p668_p8 = scmp.lt.s32.totalorder %s666_s26, %s660_s5 }
  0x5e   : > { %315 = vst [vmem:[%s269_s6] sm:$0xff] %v313_v19  ;;  %p669_p9 = por %p668_p8, %p667_p0 }
  0x60   : > { %p670_p10 = pnand %p669_p9, %p663_p13 }
  0x62   : > { %673 = shalt.err (!%p670_p10)
}
  0x63   : > { %s674_s24 = scalar_lea.hbm %s968_s30, 128  ;;  %s678_s25 = scalar_lea.hbm %s1053_s3, 256 }
  0x64   : > { %p675_p11 = scmp.ne.s32.totalorder %s968_s30, %s674_s24  ;;  %p679_p7 = scmp.lt.s32.totalorder %s968_s30, %s1053_s3 }
  0x65   : > { %p680_p6 = scmp.lt.s32.totalorder %s678_s25, %s674_s24 }
  0x66   : > { %p676_p1 = pnand %p675_p11, %p1064_p4 }
  0x67   : > { %p681_p5 = por %p680_p6, %p679_p7 }
  0x68   : > { %p677_p3 = pneg %p676_p1 }
  0x6a   : > { %p682_p2 = pnand %p681_p5, %p677_p3 }
  0x6c   : > { %685 = shalt.err (!%p682_p2)
}
  0x6d   : > { %510 = dma.vmem_to_hbm [thread:$0]  (%p1064_p4), %s970_s11, 128, %s968_s30, %s322_s9   ;;  %311 = vst [vmem:[%s962_s4] sm:$0xff] %v309_v21 }
  0x6e   : > { %s317_s5 = scalar_lea.sflag [#allocation4], %s958_s21  ;;  %s686_s10 = scalar_lea.vmem %s977_s15, 128 }
  0x6f   : > { %p687_p12 = scmp.ne.s32.totalorder %s977_s15, %s686_s10  ;;  %s802_s20 = smov [#allocation7]  }
  0x70   : > { %s690_s26 = sshll.u32 %s802_s20, 4  ;;  %s691_s26 = int_to_ptr.vmem [resolvable:$false] %s690_s26 }
  0x71   : > { %p688_p13 = pnand %p687_p12, %p1064_p4  ;;  %s692_s24 = scalar_lea.vmem %s691_s26, 256 }
  0x72   : > { %p693_p8 = scmp.lt.s32.totalorder %s977_s15, %s691_s26  ;;  %p694_p9 = scmp.lt.s32.totalorder %s692_s24, %s686_s10 }
  0x73   : > { %p689_p0 = pneg %p688_p13 }
  0x74   : > { %p695_p10 = por %p694_p9, %p693_p8 }
  0x76   : > { %p696_p11 = pnand %p695_p10, %p689_p0 }
  0x78   : > { %699 = shalt.err (!%p696_p11)
}
  0x79   : > { %s700_s11 = scalar_lea.hbm %s975_s8, 128  ;;  %s704_s30 = scalar_lea.hbm %s1052_s2, 256 }
  0x7a   : > { %p701_p1 = scmp.ne.s32.totalorder %s975_s8, %s700_s11  ;;  %p705_p6 = scmp.lt.s32.totalorder %s975_s8, %s1052_s2 }
  0x7b   : > { %p706_p5 = scmp.lt.s32.totalorder %s704_s30, %s700_s11 }
  0x7c   : > { %p702_p3 = pnand %p701_p1, %p1064_p4 }
  0x7d   : > { %p707_p2 = por %p706_p5, %p705_p6 }
  0x7e   : > { %p703_p7 = pneg %p702_p3 }
  0x80   : > { %p708_p12 = pnand %p707_p2, %p703_p7 }
  0x82   : > { %711 = shalt.err (!%p708_p12)
}
  0x83   : > { %509 = dma.vmem_to_hbm [thread:$0]  (%p1064_p4), %s977_s15, 128, %s975_s8, %s317_s5  }
  0x84 PF: > { %s360_s23 = sand.u32 1, %s767_s12   ;;  %p1065_p13 = scmp.ne.s32.totalorder %s1059_s29, 0 }
  0x85   : > { %p1066_p0 = scmp.ge.s32.totalorder %s795_s19, 2  ;;  %s361_s25 = scalar_lea.sflag [#allocation4], %s360_s23 }
  0x87   : > { %p521_p8 = pnand %p1066_p0, %p1065_p13 }
  0x89   : > { %p522_p9 = pneg %p521_p8 }
  0x8b   : > { %757 = dma.done.wait (%p522_p9), %s361_s25, 128  }
  0x8c   : > { %759 = vsyncadd (%p522_p9), %s361_s25, 4294967168  ;;  %s370_s17 = scalar_lea.sflag [#allocation9], %s360_s23 }
  0x8d   : > { %761 = dma.done.wait (%p522_p9), %s370_s17, 128  }
  0x8e   : > { %763 = vsyncadd (%p522_p9), %s370_s17, 4294967168  ;;  %s26_s19 = sadd.s32 1, %s795_s19   ;;  %s1067_s12 = smov %s771_s13 }
  0x8f   : > { %p23_p10 = scmp.ge.s32.totalorder %s26_s19, 4   ;;  %s1068_s13 = smov %s775_s14 }
  0x90   : > { %s1069_s14 = smov %s881_s27  ;;  %s1070_s15 = smov %s783_s16 }
  0x91   : > { %s1040_s16 = smov 0   ;;  %s1071_s17 = smov %s791_s18 }
  0x92   : > { %s1072_s18 = smov %s1074_s22  ;;  %25 = sbr.rel (!%p23_p10) target bundleno = 11 (0xb), region = 107 }
  0x97   :  { %375 = vsyncpa [#allocation3], 1 }
  0x98   :  { %377 = vsyncpa [#allocation3 + $0x1], 1 }
  0x99   :  { %378 = vsyncpa [#allocation6], 1 }
  0x9a   :  { %380 = vsyncpa [#allocation6 + $0x1], 1 }
  0x9b   :  { %381 = vsyncpa [#allocation4], 1 }
  0x9c   :  { %383 = vsyncpa [#allocation4 + $0x1], 1 }
  0x9d   :  { %384 = vsyncpa [#allocation9], 1 }
  0x9e   :  { %386 = vsyncpa [#allocation9 + $0x1], 1 }

</bundles_post_ra>
